<compile_context>
chip_gen: v5e
topology: v5e:2x2
jax: 0.10.0
libtpu: 0.0.40
codegen_flags: <defaults>
</compile_context>

<pallas_src>
import numpy as np

import jax
import jax.numpy as jnp
from jax.experimental import pallas as pl
from jax.experimental.pallas import tpu as pltpu

PI = 3.1415927410125732  # f32 pi, same constant as the PyTorch module


def _round_up(n: int, m: int) -> int:
    return ((n + m - 1) // m) * m


def _posmap_kernel(x_ref, r_ref, freq_ref, phase_ref, wid_ref, wenc_ref, o_ref):
    """One row-tile of the positional mapping.

    x_ref    : (tb, G*D)         G original rows folded into the lane axis
    r_ref    : (G*D, G*out_dim)  constant 0/1 routing matrix (MXU)
    freq_ref : (1, G*out_dim)    per-column frequency (0 on identity columns)
    phase_ref: (1, G*out_dim)    0 on sin columns, pi/2 on cos columns
    wid_ref  : (1, G*out_dim)    1 on identity columns, 0 elsewhere
    wenc_ref : (1, G*out_dim)    1/scale on encoded columns, 0 on identity columns
    o_ref    : (tb, G*out_dim)
    """
    xf = x_ref[...].astype(jnp.float32)
    # MXU routing: xb[:, g*out_dim + k*D + d] = x[:, g*D + d] for every component k.
    # Exact for a 0/1 weight matrix at HIGHEST precision (every bf16 pass routes a chunk
    # of x unchanged); keeps the interleave off the VPU/XLU entirely.
    xb = jnp.dot(xf, r_ref[...],
                 preferred_element_type=jnp.float32,
                 precision=jax.lax.Precision.HIGHEST)
    # One full-width transcendental pass covers the sin and cos columns of every octave.
    enc = jnp.sin(xb * freq_ref[...] + phase_ref[...])
    out = xb * wid_ref[...] + enc * wenc_ref[...]
    o_ref[...] = out.astype(o_ref.dtype)


def _routing_tables(D: int, L: int, G: int, scale: float):
    """Constant routing / frequency / phase / blend tables (numpy, float32)."""
    n_comp = 2 * L + 1
    out_dim = D * n_comp
    GO = G * out_dim
    R = np.zeros((G * D, GO), dtype=np.float32)
    freq = np.zeros((1, GO), dtype=np.float32)
    phase = np.zeros((1, GO), dtype=np.float32)
    w_id = np.zeros((1, GO), dtype=np.float32)
    w_enc = np.zeros((1, GO), dtype=np.float32)
    pi32 = np.float32(PI)
    half_pi = pi32 / np.float32(2.0)
    inv_scale = np.float32(1.0) if scale == 1.0 else np.float32(1.0 / scale)
    for g in range(G):
        for k in range(n_comp):
            for d in range(D):
                c = g * out_dim + k * D + d
                R[g * D + d, c] = 1.0
                if k == 0:
                    w_id[0, c] = 1.0        # identity column: out = x (freq/phase stay 0)
                else:
                    i = (k - 1) // 2
                    # scale folded into the frequency: matches torch to the last ulp
                    # (exactly for power-of-two scales).
                    freq[0, c] = np.float32(2.0 ** i) * pi32 * np.float32(scale)
                    phase[0, c] = np.float32(0.0) if (k % 2 == 1) else half_pi
                    w_enc[0, c] = inv_scale
    return R, freq, phase, w_id, w_enc


def positional_mapping(x: jax.Array, L: int = 5, scale: float = 1.0, *,
                       out_dtype=None, block_rows: int = 8192) -> jax.Array:
    """Pallas TPU implementation of PositionalMapping.forward (maps the last dim)."""
    if out_dtype is None:
        out_dtype = x.dtype
    D = x.shape[-1]
    lead = x.shape[:-1]
    if L == 0:
        # Matches torch: returns x * scale (no encoding, no /scale).
        return (x * scale).astype(out_dtype)

    n_comp = 2 * L + 1
    out_dim = D * n_comp
    x2 = x.reshape(-1, D)
    B = x2.shape[0]

    # Lane-densification: fold G consecutive rows into the lane axis (free row-major
    # reshape).  G is capped at 8 so the constant routing matmul stays well under the
    # HBM roofline on all generations; for D=4 this gives 352-lane tiles vs 4/128 before.
    G = max(1, min(8, -(-128 // D)))
    GD, GO = G * D, G * out_dim

    # Pad only to the 8*G row granularity (not the tile size).  B % (8*G) == 0 is the
    # zero-copy path; the ragged last *tile* is handled by Pallas masking instead.
    Bp = _round_up(max(B, 1), 8 * G)
    xp = x2 if Bp == B else jnp.pad(x2, ((0, Bp - B), (0, 0)))
    Bd = Bp // G
    xd = xp.reshape(Bd, GD)

    tables = _routing_tables(D, L, G, float(scale))
    R, freq, phase, w_id, w_enc = (jnp.asarray(t) for t in tables)

    # --- dense-row tile selection -------------------------------------------------
    # Multiple of 8, VMEM-budgeted (double-buffered in/out blocks plus ~4 live f32
    # temporaries in the body) so the default scoped VMEM limit (16 MiB on v5e) holds,
    # and capped to ~half the rows so v7x's second TensorCore gets a grid step.
    in_row = _round_up(GD, 128) * jnp.dtype(x.dtype).itemsize
    out_row = _round_up(GO, 128) * jnp.dtype(out_dtype).itemsize
    tmp_row = _round_up(GO, 128) * 4 * 4
    per_row = 2 * (in_row + out_row) + tmp_row
    budget = 12 * 1024 * 1024
    cap = max(8, (budget // per_row) // 8 * 8)

    tb = max(8, min(block_rows // G, cap) // 8 * 8)
    if Bd >= 16:
        tb = min(tb, _round_up(pl.cdiv(Bd, 2), 8))   # >= 2 "parallel" steps for v7x megacore
    tb = min(tb, Bd)

    grid = (pl.cdiv(Bd, tb),)

    out_dense = pl.pallas_call(
        _posmap_kernel,
        out_shape=jax.ShapeDtypeStruct((Bd, GO), out_dtype),
        grid=grid,
        in_specs=[
            pl.BlockSpec((tb, GD), lambda i: (i, 0)),
            # Constant tables: same block every step, so Pallas fetches them once.
            pl.BlockSpec((GD, GO), lambda i: (0, 0)),
            pl.BlockSpec((1, GO), lambda i: (0, 0)),
            pl.BlockSpec((1, GO), lambda i: (0, 0)),
            pl.BlockSpec((1, GO), lambda i: (0, 0)),
            pl.BlockSpec((1, GO), lambda i: (0, 0)),
        ],
        out_specs=pl.BlockSpec((tb, GO), lambda i: (i, 0)),
        compiler_params=pltpu.CompilerParams(dimension_semantics=("parallel",)),
    )(xd, R, freq, phase, w_id, w_enc)

    out = out_dense.reshape(Bp, out_dim)
    if Bp != B:
        out = out[:B]
    return out.reshape(*lead, out_dim)


def _reference(x, L=5, scale=1.0):
    # Pure-JAX reference mirroring the PyTorch module exactly.
    x = x * scale
    if L == 0:
        return x
    h = [x]
    for i in range(L):
        h.append(jnp.sin(2 ** i * PI * x))
        h.append(jnp.cos(2 ** i * PI * x))
    return jnp.concatenate(h, axis=-1) / scale


if __name__ == "__main__":
    key = jax.random.PRNGKey(0)
    k1, k2 = jax.random.split(key)

    # Small shape matching the module's typical use (batch=2, input_dim=4).
    B, D, L = 2, 4, 5
    x = jax.random.normal(k1, (B, D), dtype=jnp.float32)

    out = jax.block_until_ready(positional_mapping(x, L=L, scale=1.0))
    ref = _reference(x, L=L, scale=1.0)
    assert out.shape == (B, D * (2 * L + 1)), out.shape
    # f32 trig with |arg| up to ~1e2: leave a few e-5 of slack for range-reduction
    # differences between the in-kernel sin(t + pi/2) and XLA's cos.
    assert jnp.allclose(out, ref, atol=1e-4, rtol=1e-4), "mismatch vs reference (small)"

    # Non-multiple batch (pad to 8*G, ragged last tile, 2 grid steps) and non-unit scale.
    B2 = 300
    x2 = jax.random.normal(k2, (B2, D), dtype=jnp.float32)
    out2 = jax.block_until_ready(positional_mapping(x2, L=L, scale=0.5, block_rows=256))
    ref2 = _reference(x2, L=L, scale=0.5)
    assert out2.shape == (B2, D * (2 * L + 1)), out2.shape
    assert jnp.allclose(out2, ref2, atol=1e-4, rtol=1e-4), "mismatch vs reference (tiled)"

    # bf16 output path (internal math stays f32) for bandwidth-bound v5e/v6e callers.
    out3 = jax.block_until_ready(
        positional_mapping(x, L=L, scale=1.0, out_dtype=jnp.bfloat16))
    assert out3.dtype == jnp.bfloat16
    assert jnp.allclose(out3.astype(jnp.float32), ref, atol=3e-2, rtol=3e-2), \
        "mismatch vs reference (bf16 out)"

    print("KERNEL_OK")
</pallas_src>

<mosaic_0001>
module attributes {stable_mosaic.version = 11 : i64} {
  func.func @_posmap_kernel(%arg0: i32, %arg1: memref<8x32xf32, #tpu.memory_space<vmem>>, %arg2: memref<32x352xf32, #tpu.memory_space<vmem>>, %arg3: memref<1x352xf32, #tpu.memory_space<vmem>>, %arg4: memref<1x352xf32, #tpu.memory_space<vmem>>, %arg5: memref<1x352xf32, #tpu.memory_space<vmem>>, %arg6: memref<1x352xf32, #tpu.memory_space<vmem>>, %arg7: memref<8x352xf32, #tpu.memory_space<vmem>>) attributes {dimension_semantics = [#tpu.dimension_semantics<parallel>], iteration_bounds = array<i64: 1>, scalar_prefetch = 0 : i64, scratch_operands = 0 : i64, tpu.core_type = #tpu.core_type<tc>, window_params = [{transform_indices = @transform_0, window_bounds = array<i64: 8, 32>}, {pipeline_mode = #tpu.pipeline_mode<synchronous>, transform_indices = @transform_1, window_bounds = array<i64: 32, 352>}, {pipeline_mode = #tpu.pipeline_mode<synchronous>, transform_indices = @transform_2, window_bounds = array<i64: 1, 352>}, {pipeline_mode = #tpu.pipeline_mode<synchronous>, transform_indices = @transform_3, window_bounds = array<i64: 1, 352>}, {pipeline_mode = #tpu.pipeline_mode<synchronous>, transform_indices = @transform_4, window_bounds = array<i64: 1, 352>}, {pipeline_mode = #tpu.pipeline_mode<synchronous>, transform_indices = @transform_5, window_bounds = array<i64: 1, 352>}, {transform_indices = @transform_6, window_bounds = array<i64: 8, 352>}]} {
    %c0 = arith.constant 0 : index
    %c0_0 = arith.constant 0 : index
    %0 = vector.load %arg1[%c0, %c0_0] : memref<8x32xf32, #tpu.memory_space<vmem>>, vector<8x32xf32>
    %c0_1 = arith.constant 0 : index
    %c0_2 = arith.constant 0 : index
    %1 = vector.load %arg2[%c0_1, %c0_2] : memref<32x352xf32, #tpu.memory_space<vmem>>, vector<32x352xf32>
    %cst = arith.constant dense<0.000000e+00> : vector<8x352xf32>
    %2 = tpu.matmul %0, %1, %cst {dimension_numbers = #tpu.dot_dimension_numbers<[1], [0], [0], [1], [0, 0, 1, 1], [], []>, precision = #tpu.contract_precision<fp32>} : vector<8x32xf32>, vector<32x352xf32>, vector<8x352xf32> -> vector<8x352xf32>
    %c0_3 = arith.constant 0 : index
    %c0_4 = arith.constant 0 : index
    %3 = vector.load %arg3[%c0_3, %c0_4] : memref<1x352xf32, #tpu.memory_space<vmem>>, vector<1x352xf32>
    %4 = vector.broadcast %3 : vector<1x352xf32> to vector<8x352xf32>
    %5 = arith.mulf %2, %4 : vector<8x352xf32>
    %c0_5 = arith.constant 0 : index
    %c0_6 = arith.constant 0 : index
    %6 = vector.load %arg4[%c0_5, %c0_6] : memref<1x352xf32, #tpu.memory_space<vmem>>, vector<1x352xf32>
    %7 = vector.broadcast %6 : vector<1x352xf32> to vector<8x352xf32>
    %8 = arith.addf %5, %7 : vector<8x352xf32>
    %9 = math.sin %8 : vector<8x352xf32>
    %c0_7 = arith.constant 0 : index
    %c0_8 = arith.constant 0 : index
    %10 = vector.load %arg5[%c0_7, %c0_8] : memref<1x352xf32, #tpu.memory_space<vmem>>, vector<1x352xf32>
    %11 = vector.broadcast %10 : vector<1x352xf32> to vector<8x352xf32>
    %12 = arith.mulf %2, %11 : vector<8x352xf32>
    %c0_9 = arith.constant 0 : index
    %c0_10 = arith.constant 0 : index
    %13 = vector.load %arg6[%c0_9, %c0_10] : memref<1x352xf32, #tpu.memory_space<vmem>>, vector<1x352xf32>
    %14 = vector.broadcast %13 : vector<1x352xf32> to vector<8x352xf32>
    %15 = arith.mulf %9, %14 : vector<8x352xf32>
    %16 = arith.addf %12, %15 : vector<8x352xf32>
    %c0_11 = arith.constant 0 : index
    %c0_12 = arith.constant 0 : index
    %17 = vector.load %arg7[%c0_11, %c0_12] : memref<8x352xf32, #tpu.memory_space<vmem>>, vector<8x352xf32>
    tpu.vector_store %arg7[%c0_11, %c0_12], %16 {strides = array<i32>} : memref<8x352xf32, #tpu.memory_space<vmem>>, vector<8x352xf32>,
    return
  }
  func.func @transform_0(%arg0: i32) -> (i32, i32) {
    %c0_i32 = arith.constant 0 : i32
    %c0_i32_0 = arith.constant 0 : i32
    return %arg0, %c0_i32 : i32, i32
  }
  func.func @transform_1(%arg0: i32) -> (i32, i32) {
    %c0_i32 = arith.constant 0 : i32
    %c0_i32_0 = arith.constant 0 : i32
    %c0_i32_1 = arith.constant 0 : i32
    return %c0_i32, %c0_i32_0 : i32, i32
  }
  func.func @transform_2(%arg0: i32) -> (i32, i32) {
    %c0_i32 = arith.constant 0 : i32
    %c0_i32_0 = arith.constant 0 : i32
    %c0_i32_1 = arith.constant 0 : i32
    return %c0_i32, %c0_i32_0 : i32, i32
  }
  func.func @transform_3(%arg0: i32) -> (i32, i32) {
    %c0_i32 = arith.constant 0 : i32
    %c0_i32_0 = arith.constant 0 : i32
    %c0_i32_1 = arith.constant 0 : i32
    return %c0_i32, %c0_i32_0 : i32, i32
  }
  func.func @transform_4(%arg0: i32) -> (i32, i32) {
    %c0_i32 = arith.constant 0 : i32
    %c0_i32_0 = arith.constant 0 : i32
    %c0_i32_1 = arith.constant 0 : i32
    return %c0_i32, %c0_i32_0 : i32, i32
  }
  func.func @transform_5(%arg0: i32) -> (i32, i32) {
    %c0_i32 = arith.constant 0 : i32
    %c0_i32_0 = arith.constant 0 : i32
    %c0_i32_1 = arith.constant 0 : i32
    return %c0_i32, %c0_i32_0 : i32, i32
  }
  func.func @transform_6(%arg0: i32) -> (i32, i32) {
    %c0_i32 = arith.constant 0 : i32
    %c0_i32_0 = arith.constant 0 : i32
    return %arg0, %c0_i32 : i32, i32
  }
}

</mosaic_0001>

<bundles_post_ra>
// kernel: tpu_custom_call.1
= control target key start
LH: loop header
LB: loop body
LE: loop exit
PB: predicated region body
PF: predicated region fallthrough
CT: control target
= control target key end

     0   :  { %11 = vsyncpa [#allocation3], 0  ;;  %s1907_s0 = inlined_call_operand.hbm [shape: f32[8,32], index: 0, kind: input, shape index: {}]   ;;  %s1908_s1 = inlined_call_operand.hbm [shape: f32[32,352], index: 1, kind: input, shape index: {}]   ;;  %s1909_s2 = inlined_call_operand.hbm [shape: f32[1,352], index: 2, kind: input, shape index: {}]   ;;  %s1910_s3 = inlined_call_operand.hbm [shape: f32[1,352], index: 3, kind: input, shape index: {}]   ;;  %s1911_s4 = inlined_call_operand.vmem [shape: f32[1,352], index: 4, kind: input, shape index: {}]   ;;  %s1912_s5 = inlined_call_operand.hbm [shape: f32[1,352], index: 5, kind: input, shape index: {}]   ;;  %s1913_s6 = inlined_call_operand.hbm [shape: f32[8,352], index: 6, kind: output, shape index: {}]  }
   0x1   :  { %12 = vsyncpa [#allocation6], 0 }
   0x2   :  { %13 = vsyncpa [#allocation9], 0  ;;  %s30_s23 = sshll.u32 %s1908_s1, 4  ;;  %s31_s23 = int_to_ptr.hbm [resolvable:$true] %s30_s23 }
   0x3   :  { %14 = vsyncpa [#allocation4], 0  ;;  %s1377_s24 = smov [#allocation5]   ;;  %s55_s28 = sshll.u32 %s1910_s3, 4  ;;  %s56_s28 = int_to_ptr.hbm [resolvable:$true] %s55_s28 }
   0x4   :  { %s32_s25 = sshll.u32 %s1377_s24, 4  ;;  %s1378_s29 = smov 384   ;;  %s33_s25 = int_to_ptr.vmem [resolvable:$true] %s32_s25 }
   0x5   :  { %s1379_s30 = smov 24   ;;  %s1380_s7 = smov [#allocation8]  }
   0x6   :  { %38 = dma.hbm_to_vmem [thread:$0]  %s31_s23, 1536, %s33_s25, [#allocation6], %s1378_s29, %s1378_s29, %s1379_s30  }
   0x7   :  { %s57_s8 = sshll.u32 %s1380_s7, 4  ;;  %s20_s11 = sshll.u32 %s1907_s0, 4  ;;  %s58_s8 = int_to_ptr.vmem [resolvable:$true] %s57_s8  ;;  %s21_s11 = int_to_ptr.hbm [resolvable:$true] %s20_s11 }
   0x8   :  { %60 = dma.hbm_to_vmem [thread:$0]  %s56_s28, 48, %s58_s8, [#allocation9]  }
   0x9   :  { %s44_s13 = sshll.u32 %s1909_s2, 4  ;;  %s1381_s14 = smov [#allocation2]   ;;  %s45_s13 = int_to_ptr.hbm [resolvable:$true] %s44_s13 }
   0xa   :  { %s22_s15 = sshll.u32 %s1381_s14, 4  ;;  %s1382_s3 = smov [#allocation7]   ;;  %s23_s15 = int_to_ptr.vmem [resolvable:$true] %s22_s15 }
   0xb   :  { %25 = dma.hbm_to_vmem [thread:$0]  %s21_s11, 128, %s23_s15, [#allocation3]  }
   0xc   :  { %s46_s16 = sshll.u32 %s1382_s3, 4  ;;  %s68_s19 = sshll.u32 %s1912_s5, 4  ;;  %s47_s16 = int_to_ptr.vmem [resolvable:$true] %s46_s16  ;;  %s69_s19 = int_to_ptr.hbm [resolvable:$true] %s68_s19 }
   0xd   :  { %49 = dma.hbm_to_vmem [thread:$0]  %s45_s13, 48, %s47_s16, [#allocation6]  }
   0xe   :  { %s1383_s0 = smov [#allocation10]  }
   0xf   :  { %s70_s20 = sshll.u32 %s1383_s0, 4  ;;  %s71_s20 = int_to_ptr.vmem [resolvable:$true] %s70_s20 }
  0x10   :  { %73 = dma.hbm_to_vmem [thread:$0]  %s69_s19, 48, %s71_s20, [#allocation9]  }
  0x11   :  { %1369 = dma.done.wait [#allocation3], 128  }
  0x12   :  { %1370 = vsyncadd [#allocation3], 4294967168 }
  0x13   :  { %1371 = dma.done.wait [#allocation6], 1584  }
  0x14   :  { %1372 = vsyncadd [#allocation6], 4294965712 }
  0x15   :  { %1373 = dma.done.wait [#allocation9], 96  }
  0x16   :  { %1374 = vsyncadd [#allocation9], 4294967200  ;;  %vm107_vm0 = vcmask 261120   ;;  %v104_v0 = vld [vmem:[#allocation5 + $0x48] sm:$0xff]  ;;  %v101_v1 = vld [vmem:[#allocation5 + $0x30] sm:$0xff]  ;;  %s1189_s24 = sshll.u32 %s1913_s6, 4  ;;  %s1190_s24 = int_to_ptr.hbm [resolvable:$true] %s1189_s24 }
  0x17   :  { %v98_v2 = vld [vmem:[#allocation5 + $0x18] sm:$0xff]  ;;  %v1442_v3 = vand.u32 4294901760, %v104_v0  ;;  %v1444_v4 = vand.u32 4294901760, %v101_v1  ;;  %v95_v6 = vld [vmem:[#allocation5] sm:$0xff]  ;;  %v105_v8 = vld [vmem:[#allocation5 + $0x50] sm:$0xff] }
  0x18   :  { %v1446_v5 = vand.u32 4294901760, %v98_v2  ;;  %v94_v7 = vld [vmem:[#allocation2] sm:$0xff]  ;;  %v1448_v9 = vand.u32 4294901760, %v95_v6  ;;  %v1450_v11 = vand.u32 4294901760, %v105_v8  ;;  %v99_v13 = vld [vmem:[#allocation5 + $0x20] sm:$0xff]  ;;  %v96_v37 = vld [vmem:[#allocation5 + $0x8] sm:$0xff] }
  0x19   :  { %v109_v10 = vsel %vm107_vm0, %v94_v7, 0  ;;  %v102_v12 = vld [vmem:[#allocation5 + $0x38] sm:$0xff]  ;;  %124 = vmatpush.msra.mxu0 %v1442_v3  ;;  %v153_v14 = vsub.f32 %v104_v0, %v1442_v3  ;;  %224 = vmatpush.msra.mxu3 %v1442_v3  ;;  %v159_v15 = vsub.f32 %v101_v1, %v1444_v4  ;;  %v1467_v21 = vand.u32 4294901760, %v99_v13  ;;  %v103_v54 = vld [vmem:[#allocation5 + $0x40] sm:$0xff]  ;;  %v100_v57 = vld [vmem:[#allocation5 + $0x28] sm:$0xff] }
  0x1a   :  { %v165_v16 = vsub.f32 %v98_v2, %v1446_v5  ;;  %v1457_v17 = vand.u32 4294901760, %v109_v10  ;;  %v1460_v18 = vsub.f32 %v95_v6, %v1448_v9  ;;  %v1463_v19 = vsub.f32 %v105_v8, %v1450_v11  ;;  %v106_v51 = vld [vmem:[#allocation5 + $0x58] sm:$0xff]  ;;  %v97_v60 = vld [vmem:[#allocation5 + $0x10] sm:$0xff] }
  0x1b   :  { %v1465_v20 = vand.u32 4294901760, %v102_v12  ;;  %195 = vmatpush.msra.mxu2 %v153_v14  ;;  %126 = vmatpush.msra.mxu0 %v1444_v4  ;;  %v154_v22 = vand.u32 4294901760, %v153_v14  ;;  %v160_v23 = vand.u32 4294901760, %v159_v15  ;;  %v1480_v29 = vsub.f32 %v99_v13, %v1467_v21 }
  0x1c   :  { %v1471_v24 = vsub.f32 %v109_v10, %v1457_v17  ;;  %v166_v25 = vand.u32 4294901760, %v165_v16  ;;  %226 = vmatpush.msra.mxu3 %v1444_v4  ;;  %v339_v26 = vand.u32 4294901760, %v1463_v19  ;;  %v172_v27 = vand.u32 4294901760, %v1460_v18 }
  0x1d   :  { %v1477_v28 = vsub.f32 %v102_v12, %v1465_v20  ;;  %198 = vmatpush.msra.mxu2 %v159_v15  ;;  %128 = vmatpush.msra.mxu0 %v1446_v5  ;;  %v155_v30 = vsub.f32 %v153_v14, %v154_v22  ;;  %v161_v31 = vsub.f32 %v159_v15, %v160_v23  ;;  %v351_v36 = vand.u32 4294901760, %v1480_v29 }
  0x1e   :  { %v1484_v32 = vand.u32 4294901760, %v1471_v24  ;;  %v167_v33 = vsub.f32 %v165_v16, %v166_v25  ;;  %228 = vmatpush.msra.mxu3 %v1446_v5  ;;  %v340_v34 = vsub.f32 %v1463_v19, %v339_v26  ;;  %v173_v41 = vsub.f32 %v1460_v18, %v172_v27 }
  0x1f   :  { %v345_v35 = vand.u32 4294901760, %v1477_v28  ;;  %v156_v38 = vand.u32 4294901760, %v155_v30  ;;  %201 = vmatpush.msra.mxu2 %v165_v16  ;;  %130 = vmatpush.msra.mxu0 %v1448_v9  ;;  %v162_v39 = vand.u32 4294901760, %v161_v31  ;;  %v352_v46 = vsub.f32 %v1480_v29, %v351_v36 }
  0x20   :  { %v134_v40 = vsub.f32 %v1471_v24, %v1484_v32  ;;  %230 = vmatpush.msra.mxu3 %v1448_v9  ;;  %v341_v42 = vand.u32 4294901760, %v340_v34  ;;  %v168_v45 = vand.u32 4294901760, %v167_v33  ;;  %v1506_v47 = vand.u32 4294901760, %v96_v37 }
  0x21   :  { %253 = vmatpush.msrb.mxu0 %v154_v22  ;;  %v346_v43 = vsub.f32 %v1477_v28, %v345_v35  ;;  %157 = vmatpush.msra.mxu1 %v156_v38  ;;  %v174_v49 = vand.u32 4294901760, %v173_v41  ;;  %v353_v52 = vand.u32 4294901760, %v352_v46  ;;  %v1514_v56 = vand.u32 4294901760, %v106_v51 }
  0x22   :  { %204 = vmatpush.msra.mxu2 %v1460_v18  ;;  %v1501_v44 = vand.u32 4294901760, %v134_v40  ;;  %234 = vmatmul.f32.vlgmr.msra.gmra.mxu3 %v1484_v32  ;;  %v356_v50 = vsub.f32 %v96_v37, %v1506_v47  ;;  %v1519_v59 = vand.u32 4294901760, %v103_v54  ;;  %v1526_v62 = vand.u32 4294901760, %v100_v57 }
  0x23   :  { %207 = vmatmul.f32.vlgmr.msra.gmra.mxu2 %v1471_v24  ;;  %v347_v48 = vand.u32 4294901760, %v346_v43  ;;  %163 = vmatpush.msra.mxu1 %v162_v39  ;;  %v1524_v61 = vsub.f32 %v106_v51, %v1514_v56  ;;  %v1533_v0 = vand.u32 4294901760, %v97_v60 }
  0x24   :  { %136 = vmatmul.f32.vlgmr.msra.gmra.mxu0 %v1501_v44  ;;  %309 = vmatpush.msrb.mxu2 %v1450_v11  ;;  %v357_v53 = vand.u32 4294901760, %v356_v50  ;;  %v529_v63 = vsub.f32 %v103_v54, %v1519_v59  ;;  %v535_v2 = vsub.f32 %v100_v57, %v1526_v62 }
  0x25   :  { %342 = vmatpush.msrb.mxu3 %v341_v42  ;;  %169 = vmatpush.msra.mxu1 %v168_v45  ;;  %v524_v1 = vand.u32 4294901760, %v1524_v61 }
  0x26   :  { %257 = vmatpush.msrb.mxu0 %v160_v23  ;;  %311 = vmatpush.msrb.mxu2 %v1465_v20  ;;  %v358_v55 = vsub.f32 %v356_v50, %v357_v53  ;;  %v536_v6 = vand.u32 4294901760, %v535_v2 }
  0x27   :  { %348 = vmatpush.msrb.mxu3 %v347_v48  ;;  %175 = vmatpush.msra.mxu1 %v174_v49 }
  0x28   :  { %261 = vmatpush.msrb.mxu0 %v166_v25  ;;  %177 = vmatmul.f32.vlgmr.msra.gmra.mxu1 %v1457_v17  ;;  %v359_v58 = vand.u32 4294901760, %v358_v55  ;;  %v537_v10 = vsub.f32 %v535_v2, %v536_v6 }
  0x29   :  { %313 = vmatpush.msrb.mxu2 %v1467_v21  ;;  %284 = vmatpush.msrb.mxu1 %v1442_v3  ;;  %v530_v3 = vand.u32 4294901760, %v529_v63 }
  0x2a   :  { %354 = vmatpush.msrb.mxu3 %v353_v52  ;;  %265 = vmatpush.msrb.mxu0 %v172_v27  ;;  %v538_v13 = vand.u32 4294901760, %v537_v10 }
  0x2b   :  { %315 = vmatpush.msrb.mxu2 %v1506_v47  ;;  %286 = vmatpush.msrb.mxu1 %v1444_v4  ;;  %v541_v4 = vsub.f32 %v97_v60, %v1533_v0  ;;  %v531_v7 = vsub.f32 %v529_v63, %v530_v3  ;;  %v1385_v60 = vmov 2475754826  }
  0x2c   :  { %360 = vmatpush.msrb.mxu3 %v359_v58  ;;  %267 = vmatmul.f32.vlgmr.msrb.gmra.mxu0 %v1457_v17  ;;  %v1384_v58 = vmov 683565275  }
  0x2d   :  { %321 = vmatmul.f32.vlgmr.msrb.gmra.mxu2 %v1501_v44  ;;  %288 = vmatpush.msrb.mxu1 %v1446_v5  ;;  %v525_v5 = vsub.f32 %v1524_v61, %v524_v1  ;;  %v542_v8 = vand.u32 4294901760, %v541_v4 }
  0x2e   :  { %362 = vmatmul.f32.vlgmr.msrb.gmra.mxu3 %v1457_v17  ;;  %438 = vmatpush.msra.mxu2 %v339_v26  ;;  %v1583_v26 = vld [vmem:[#allocation8] sm:$0x7] }
  0x2f   :  { %380 = vmatpush.msra.mxu0 %v1463_v19  ;;  %290 = vmatpush.msrb.mxu1 %v1448_v9  ;;  %v526_v9 = vand.u32 4294901760, %v525_v5  ;;  %v543_v12 = vsub.f32 %v541_v4, %v542_v8 }
  0x30   :  { %469 = vmatpush.msra.mxu3 %v1450_v11  ;;  %442 = vmatpush.msra.mxu2 %v345_v35 }
  0x31   :  { %383 = vmatpush.msra.mxu0 %v1477_v28  ;;  %292 = vmatmul.f32.vlgmr.msrb.gmra.mxu1 %v1457_v17  ;;  %v544_v14 = vand.u32 4294901760, %v543_v12 }
  0x32   :  { %471 = vmatpush.msra.mxu3 %v1465_v20  ;;  %409 = vmatpush.msra.mxu1 %v1450_v11  ;;  %v532_v11 = vand.u32 4294901760, %v531_v7 }
  0x33   :  { %446 = vmatpush.msra.mxu2 %v351_v36  ;;  %386 = vmatpush.msra.mxu0 %v1480_v29 }
  0x34   :  { %473 = vmatpush.msra.mxu3 %v1467_v21  ;;  %411 = vmatpush.msra.mxu1 %v1465_v20 }
  0x35   :  { %450 = vmatpush.msra.mxu2 %v357_v53  ;;  %389 = vmatpush.msra.mxu0 %v356_v50  ;;  %v680_v53 = vperm.slane %v1583_v26, 1 }
  0x36   :  { %452 = vmatmul.f32.vlgmr.msra.gmra.mxu2 %v1457_v17  ;;  %392 = vmatmul.f32.vlgmr.msra.gmra.mxu0 %v1471_v24 }
  0x37   :  { %413 = vmatpush.msra.mxu1 %v1467_v21  ;;  %475 = vmatpush.msra.mxu3 %v1506_v47 }
  0x38   :  { %565 = vmatpush.msrb.mxu2 %v1524_v61  ;;  %477 = vmatmul.f32.vlgmr.msra.gmra.mxu3 %v1457_v17 }
  0x39   :  { %415 = vmatpush.msra.mxu1 %v1506_v47  ;;  %494 = vmatpush.msrb.mxu0 %v1514_v56 }
  0x3a   :  { %568 = vmatpush.msrb.mxu2 %v529_v63  ;;  %594 = vmatpush.msrb.mxu3 %v1514_v56 }
  0x3b   :  { %419 = vmatmul.f32.vlgmr.msra.gmra.mxu1 %v1484_v32  ;;  %496 = vmatpush.msrb.mxu0 %v1519_v59 }
  0x3c   :  { %527 = vmatpush.msrb.mxu1 %v526_v9  ;;  %571 = vmatpush.msrb.mxu2 %v535_v2  ;;  %v1389_v9 = vmov 1326507024  }
  0x3d   :  { %596 = vmatpush.msrb.mxu3 %v1519_v59  ;;  %498 = vmatpush.msrb.mxu0 %v1526_v62 }
  0x3e   :  { %533 = vmatpush.msrb.mxu1 %v532_v11  ;;  %574 = vmatpush.msrb.mxu2 %v541_v4 }
  0x3f   :  { %598 = vmatpush.msrb.mxu3 %v1526_v62  ;;  %500 = vmatpush.msrb.mxu0 %v1533_v0 }
  0x40   :  { %539 = vmatpush.msrb.mxu1 %v538_v13  ;;  %577 = vmatmul.f32.vlgmr.msrb.gmra.mxu2 %v1471_v24  ;;  %v1581_v24 = vld [vmem:[#allocation7] sm:$0x7] }
  0x41   :  { %600 = vmatpush.msrb.mxu3 %v1533_v0  ;;  %506 = vmatmul.f32.vlgmr.msrb.gmra.mxu0 %v1501_v44  ;;  %v668_v27 = vperm.slane %v1581_v24, 0  ;;  %v669_v46 = vperm.slane %v1581_v24, 1 }
  0x42   :  { %545 = vmatpush.msrb.mxu1 %v544_v14  ;;  %604 = vmatmul.f32.vlgmr.msrb.gmra.mxu3 %v1484_v32 }
  0x43   :  { %623 = vmatpush.msra.mxu0 %v524_v1  ;;  %547 = vmatmul.f32.vlgmr.msrb.gmra.mxu1 %v1457_v17 }
  0x44   :  { %654 = vmatpush.msra.mxu1 %v1514_v56 }
  0x45   :  { %627 = vmatpush.msra.mxu0 %v530_v3  ;;  %v1387_v3 = vmov 2102212464  }
  0x46   :  { %656 = vmatpush.msra.mxu1 %v1519_v59 }
  0x47   :  { %631 = vmatpush.msra.mxu0 %v536_v6  ;;  %v1388_v6 = vmov 920167782  }
  0x48   :  { %658 = vmatpush.msra.mxu1 %v1526_v62 }
  0x49   :  { %635 = vmatpush.msra.mxu0 %v542_v8 }
  0x4a   :  { %637 = vmatmul.f32.vlgmr.msra.gmra.mxu0 %v1457_v17  ;;  %660 = vmatpush.msra.mxu1 %v1533_v0  ;;  %v1386_v0 = vmov 2131351028  }
  0x4b   :  { %662 = vmatmul.f32.vlgmr.msra.gmra.mxu1 %v1457_v17  ;;  %v679_v17 = vperm.slane %v1583_v26, 0 }
  0xa1   :  { %v137_v15 = vpop.f32.mrf.mxu0 }
  0xa5   :  { %v178_v16 = vpop.f32.mrf.mxu1  ;;  %v235_v20 = vpop.f32.mrf.mxu3 }
  0xa6   :  { %v208_v18 = vpop.f32.mrf.mxu2  ;;  %v179_v19 = vadd.f32 %v178_v16, %v137_v15 }
  0xa8   :  { %v209_v21 = vadd.f32 %v208_v18, %v179_v19 }
  0xa9   :  { %v268_v22 = vpop.f32.mrf.mxu0 }
  0xaa   :  { %v236_v23 = vadd.f32 %v235_v20, %v209_v21 }
  0xac   :  { %v269_v25 = vadd.f32 %v268_v22, %v236_v23 }
  0xae   :  { %v293_v28 = vpop.f32.mrf.mxu1 }
  0xaf   :  { %v1586_v29 = vadd.f32 %v293_v28, %v269_v25 }
  0xb0   :  { %v322_v30 = vpop.f32.mrf.mxu2 }
  0xb1   :  { %v363_v31 = vpop.f32.mrf.mxu3  ;;  %v674_v32 = vmul.f32 %v668_v27, %v1586_v29 }
  0xb2   :  { %v364_v33 = vadd.f32 %v363_v31, %v322_v30 }
  0xb3   :  { %v1590_v34 = vadd.f32 %v679_v17, %v674_v32  ;;  %v393_v35 = vpop.f32.mrf.mxu0 }
  0xb4   :  { %v394_v38 = vadd.f32 %v393_v35, %v364_v33 }
  0xb5   :  { %v688_v36 = vand.u32 2147483647, %v1590_v34  ;;  %v691_v37 = vand.u32 2139095040, %v1590_v34 }
  0xb7   :  { %v692_v39 = vshrl.u32 %v691_v37, 23  ;;  %v695_v44 = vand.u32 8388607, %v688_v36 }
  0xb8   :  { %v420_v40 = vpop.f32.mrf.mxu1 }
  0xb9   :  { %v421_v41 = vadd.f32 %v420_v40, %v394_v38  ;;  %v453_v42 = vpop.f32.mrf.mxu2  ;;  %v1201_v43 = vadd.s32 4294967169, %v692_v39  ;;  %v696_v50 = vor.u32 8388608, %v695_v44 }
  0xbb   :  { %v454_v45 = vadd.f32 %v453_v42, %v421_v41  ;;  %v698_v47 = vadd.s32 1, %v1201_v43  ;;  %v478_v48 = vpop.f32.mrf.mxu3  ;;  %v1601_v56 = vshll.u32 %v696_v50, 8 }
  0xbd   :  { %v1597_v49 = vadd.f32 %v478_v48, %v454_v45  ;;  %vm699_vm1 = vcmp.gt.s32.totalorder %v698_v47, 0  ;;  %v737_v22 = vand.u32 65535, %v1601_v56  ;;  %v738_v30 = vshrl.u32 %v1601_v56, 16 }
  0xbe   :  { %v700_v51 = vsel %vm699_vm1, %v698_v47, 0 }
  0xbf   :  { %v675_v52 = vmul.f32 %v669_v46, %v1597_v49  ;;  %v702_v54 = vand.u32 31, %v700_v51  ;;  %v1603_v57 = vshrl.u32 %v700_v51, 5 }
  0xc1   :  { %v703_v55 = vsub.s32 32, %v702_v54  ;;  %v705_v59 = vshll.u32 %v1384_v58, %v702_v54  ;;  %v708_v61 = vshll.u32 %v1385_v60, %v702_v54  ;;  %v1607_v62 = vadd.f32 %v680_v53, %v675_v52 }
  0xc2   :  { %v711_v2 = vshll.u32 %v1386_v0, %v702_v54  ;;  %v714_v5 = vshll.u32 %v1387_v3, %v702_v54  ;;  %v717_v8 = vshll.u32 %v1388_v6, %v702_v54  ;;  %vm720_vm2 = vcmp.lt.s32.totalorder %v1603_v57, 1 }
  0xc3   :  { %v706_v63 = vshrl.u32 %v1385_v60, %v703_v55  ;;  %v709_v1 = vshrl.u32 %v1386_v0, %v703_v55  ;;  %v712_v4 = vshrl.u32 %v1387_v3, %v703_v55  ;;  %v715_v7 = vshrl.u32 %v1388_v6, %v703_v55 }
  0xc4   :  { %v718_v10 = vshrl.u32 %v1389_v9, %v703_v55  ;;  %v846_v16 = vand.u32 2139095040, %v1607_v62  ;;  %vm723_vm3 = vcmp.lt.s32.totalorder %v1603_v57, 4  ;;  %vm722_vm4 = vcmp.lt.s32.totalorder %v1603_v57, 3 }
  0xc5   :  { %v707_v11 = vor.u32 %v706_v63, %v705_v59  ;;  %v710_v12 = vor.u32 %v709_v1, %v708_v61  ;;  %v713_v13 = vor.u32 %v712_v4, %v711_v2  ;;  %v716_v14 = vor.u32 %v715_v7, %v714_v5 }
  0xc6   :  { %v719_v15 = vor.u32 %v718_v10, %v717_v8  ;;  %vm721_vm5 = vcmp.lt.s32.totalorder %v1603_v57, 2  ;;  %v847_v27 = vshrl.u32 %v846_v16, 23  ;;  %v843_v31 = vand.u32 2147483647, %v1607_v62 }
  0xc7   :  { %v728_v18 = vsel %vm720_vm2, %v707_v11, %v710_v12  ;;  %v732_v19 = vsel %vm720_vm2, %v710_v12, %v713_v13  ;;  %v729_v20 = vsel %vm723_vm3, %v716_v14, 920167782  ;;  %v704_v38 = vshrl.u32 %v1384_v58, %v703_v55 }
  0xc8   :  { %v733_v21 = vsel %vm723_vm3, %v719_v15, 1326507024  ;;  %v730_v23 = vsel %vm722_vm4, %v713_v13, %v729_v20  ;;  %v725_v39 = vsel %vm723_vm3, %v713_v13, 2102212464  ;;  %v1204_v42 = vadd.s32 4294967169, %v847_v27 }
  0xc9   :  { %v734_v25 = vsel %vm722_vm4, %v716_v14, %v733_v21  ;;  %v731_v28 = vsel %vm721_vm5, %v728_v18, %v730_v23  ;;  %v724_v43 = vsel %vm720_vm2, %v704_v38, %v707_v11  ;;  %v726_v46 = vsel %vm722_vm4, %v710_v12, %v725_v39  ;;  %v548_v12 = vpop.f32.mrf.mxu1 }
  0xca   :  { %v735_v17 = vsel %vm721_vm5, %v732_v19, %v734_v25  ;;  %v761_v35 = vand.u32 65535, %v731_v28  ;;  %v762_v37 = vshrl.u32 %v731_v28, 16  ;;  %v1650_v50 = vand.u32 8388607, %v843_v31 }
  0xcb   :  { %v739_v32 = vand.u32 65535, %v735_v17  ;;  %v740_v33 = vshrl.u32 %v735_v17, 16  ;;  %v853_v61 = vadd.s32 1, %v1204_v42  ;;  %v1390_v63 = vmov 0  }
  0xcc   :  { %v764_v44 = vmul.u32 %v762_v37, %v737_v22  ;;  %v765_v45 = vmul.u32 %v761_v35, %v738_v30  ;;  %v763_v52 = vmul.u32 %v761_v35, %v737_v22  ;;  %v766_v53 = vmul.u32 %v762_v37, %v738_v30 }
  0xcd   :  { %v742_v40 = vmul.u32 %v740_v33, %v737_v22  ;;  %v743_v41 = vmul.u32 %v739_v32, %v738_v30  ;;  %v741_v47 = vmul.u32 %v739_v32, %v737_v22  ;;  %v744_v51 = vmul.u32 %v740_v33, %v738_v30  ;;  %v507_v22 = vpop.f32.mrf.mxu0 }
  0xce   :  { %v767_v54 = vshll.u32 %v764_v44, 16  ;;  %v769_v2 = vshll.u32 %v765_v45, 16  ;;  %vm854_vm9 = vcmp.gt.s32.totalorder %v853_v61, 0  ;;  %v727_v8 = vsel %vm721_vm5, %v724_v43, %v726_v46 }
  0xcf   :  { %v745_v48 = vshll.u32 %v742_v40, 16  ;;  %v747_v55 = vshll.u32 %v743_v41, 16  ;;  %v746_v13 = vshrl.u32 %v742_v40, 16  ;;  %v855_v16 = vsel %vm854_vm9, %v853_v61, 0 }
  0xd0   :  { %vm771_vm7 = vc.u32 %v763_v52, %v767_v54  ;;  %v773_v4 = vadd.s32 %v767_v54, %v763_v52  ;;  %v768_v18 = vshrl.u32 %v764_v44, 16  ;;  %v851_v20 = vor.u32 8388608, %v1650_v50 }
  0xd1   :  { %vm749_vm6 = vc.u32 %v741_v47, %v745_v48  ;;  %v751_v59 = vadd.s32 %v745_v48, %v741_v47  ;;  %v772_v7 = vsel %vm771_vm7, 1, %v1390_v63  ;;  %v857_v21 = vand.u32 31, %v855_v16 }
  0xd2   :  { %v750_v1 = vsel %vm749_vm6, 1, %v1390_v63  ;;  %v774_v11 = vadd.s32 %v772_v7, %v766_v53  ;;  %vm775_vm10 = vc.u32 %v773_v4, %v769_v2  ;;  %v748_v23 = vshrl.u32 %v743_v41, 16 }
  0xd3   :  { %v752_v5 = vadd.s32 %v750_v1, %v744_v51  ;;  %vm753_vm8 = vc.u32 %v751_v59, %v747_v55  ;;  %v776_v15 = vsel %vm775_vm10, 1, %v1390_v63  ;;  %v770_v57 = vshrl.u32 %v765_v45, 16  ;;  %v578_v51 = vpop.f32.mrf.mxu2 }
  0xd4   :  { %v754_v10 = vsel %vm753_vm8, 1, %v1390_v63  ;;  %v778_v19 = vadd.s32 %v776_v15, %v774_v11  ;;  %v549_v27 = vadd.f32 %v548_v12, %v507_v22  ;;  %v1659_v28 = vadd.s32 %v773_v4, %v769_v2 }
  0xd5   :  { %v756_v14 = vadd.s32 %v754_v10, %v752_v5  ;;  %v1661_v30 = vshrl.u32 %v855_v16, 5  ;;  %v1663_v32 = vsub.s32 32, %v857_v21  ;;  %v860_v35 = vshll.u32 %v1384_v58, %v857_v21 }
  0xd6   :  { %v779_v17 = vadd.s32 %v778_v19, %v768_v18  ;;  %v863_v37 = vshll.u32 %v1385_v60, %v857_v21  ;;  %v866_v38 = vshll.u32 %v1386_v0, %v857_v21  ;;  %v869_v42 = vshll.u32 %v1387_v3, %v857_v21 }
  0xd7   :  { %v757_v25 = vadd.s32 %v756_v14, %v746_v13  ;;  %v861_v40 = vshrl.u32 %v1385_v60, %v1663_v32  ;;  %v864_v41 = vshrl.u32 %v1386_v0, %v1663_v32  ;;  %v867_v43 = vshrl.u32 %v1387_v3, %v1663_v32 }
  0xd8   :  { %v780_v39 = vadd.s32 %v779_v17, %v770_v57  ;;  %v870_v44 = vshrl.u32 %v1388_v6, %v1663_v32  ;;  %v872_v45 = vshll.u32 %v1388_v6, %v857_v21  ;;  %v873_v50 = vshrl.u32 %v1389_v9, %v1663_v32 }
  0xd9   :  { %v1665_v33 = vadd.s32 %v757_v25, %v748_v23  ;;  %v1682_v47 = vor.u32 %v861_v40, %v860_v35  ;;  %v1684_v48 = vor.u32 %v864_v41, %v863_v37  ;;  %v781_v52 = vmul.u32 %v1601_v56, %v727_v8  ;;  %v605_v8 = vpop.f32.mrf.mxu3  ;;  %v638_v23 = vpop.f32.mrf.mxu0 }
  0xda   :  { %v784_v46 = vadd.s32 1, %v780_v39  ;;  %v1689_v53 = vor.u32 %v867_v43, %v866_v38  ;;  %v871_v54 = vor.u32 %v870_v44, %v869_v42  ;;  %v874_v59 = vor.u32 %v873_v50, %v872_v45  ;;  %v663_v42 = vpop.f32.mrf.mxu1 }
  0xdb   :  { %vm783_vm11 = vc.u32 %v1665_v33, %v1659_v28  ;;  %vm875_vm12 = vcmp.lt.s32.totalorder %v1661_v30, 1  ;;  %v1692_v61 = vshll.u32 %v851_v20, 8  ;;  %vm878_vm13 = vcmp.lt.s32.totalorder %v1661_v30, 4 }
  0xdc   :  { %v785_v55 = vsel %vm783_vm11, %v784_v46, %v780_v39  ;;  %v883_v2 = vsel %vm875_vm12, %v1682_v47, %v1684_v48  ;;  %v579_v4 = vadd.f32 %v578_v51, %v549_v27  ;;  %vm877_vm14 = vcmp.lt.s32.totalorder %v1661_v30, 3 }
  0xdd   :  { %v786_v1 = vadd.s32 %v785_v55, %v781_v52  ;;  %v884_v56 = vsel %vm878_vm13, %v871_v54, 920167782  ;;  %v887_v5 = vsel %vm875_vm12, %v1684_v48, %v1689_v53  ;;  %v888_v7 = vsel %vm878_vm13, %v874_v59, 1326507024 }
  0xde   :  { %vm876_vm15 = vcmp.lt.s32.totalorder %v1661_v30, 2  ;;  %v885_v11 = vsel %vm877_vm14, %v1689_v53, %v884_v56  ;;  %v889_v12 = vsel %vm877_vm14, %v871_v54, %v888_v7  ;;  %v892_v15 = vand.u32 65535, %v1692_v61 }
  0xdf   :  { %v787_v10 = vadd.s32 536870912, %v786_v1  ;;  %v886_v13 = vsel %vm876_vm15, %v883_v2, %v885_v11  ;;  %v890_v14 = vsel %vm876_vm15, %v887_v5, %v889_v12  ;;  %v606_v20 = vadd.f32 %v605_v8, %v579_v4 }
  0xe0   :  { %v894_v18 = vand.u32 65535, %v890_v14  ;;  %v895_v19 = vshrl.u32 %v890_v14, 16  ;;  %v893_v21 = vshrl.u32 %v1692_v61, 16  ;;  %v917_v22 = vshrl.u32 %v886_v13, 16 }
  0xe1   :  { %v1719_v16 = vshrl.u32 %v787_v10, 30  ;;  %v916_v27 = vand.u32 65535, %v886_v13  ;;  %v639_v40 = vadd.f32 %v638_v23, %v606_v20  ;;  %v670_v59 = vperm.slane %v1581_v24, 2 }
  0xe2   :  { %v897_v57 = vmul.u32 %v895_v19, %v892_v15  ;;  %v898_v17 = vmul.u32 %v894_v18, %v893_v21  ;;  %v919_v35 = vmul.u32 %v917_v22, %v892_v15  ;;  %v896_v38 = vmul.u32 %v894_v18, %v892_v15 }
  0xe3   :  { %v789_v25 = vshll.u32 %v1719_v16, 30  ;;  %v899_v41 = vmul.u32 %v895_v19, %v893_v21  ;;  %v920_v44 = vmul.u32 %v916_v27, %v893_v21  ;;  %v1724_v55 = vadd.f32 %v663_v42, %v639_v40 }
  0xe4   :  { %v900_v39 = vshll.u32 %v897_v57, 16  ;;  %v902_v45 = vshll.u32 %v898_v17, 16  ;;  %v922_v51 = vshll.u32 %v919_v35, 16  ;;  %v918_v2 = vmul.u32 %v916_v27, %v892_v15 }
  0xe5   :  { %v790_v37 = vsub.s32 %v786_v1, %v789_v25  ;;  %v681_v4 = vperm.slane %v1583_v26, 2  ;;  %v901_v56 = vshrl.u32 %v897_v57, 16  ;;  %v921_v7 = vmul.u32 %v917_v22, %v893_v21 }
  0xe6   :  { %vm904_vm1 = vc.u32 %v896_v38, %v900_v39  ;;  %v906_v50 = vadd.s32 %v900_v39, %v896_v38  ;;  %v924_v8 = vshll.u32 %v920_v44, 16  ;;  %vm926_vm3 = vc.u32 %v918_v2, %v922_v51 }
  0xe7   :  { %vm791_vm0 = vcmp.lt.s32.totalorder %v790_v37, 0  ;;  %v792_v43 = vsub.s32 0, %v790_v37  ;;  %v905_v46 = vsel %vm904_vm1, 1, %v1390_v63  ;;  %v928_v12 = vadd.s32 %v922_v51, %v918_v2 }
  0xe8   :  { %v907_v54 = vadd.s32 %v905_v46, %v899_v41  ;;  %vm908_vm2 = vc.u32 %v906_v50, %v902_v45  ;;  %v859_v13 = vshrl.u32 %v1384_v58, %v1663_v32  ;;  %v880_v24 = vsel %vm878_vm13, %v1689_v53, 2102212464 }
  0xe9   :  { %v793_v52 = vsel %vm791_vm0, %v792_v43, %v790_v37  ;;  %v909_v5 = vsel %vm908_vm2, 1, %v1390_v63  ;;  %v927_v14 = vsel %vm926_vm3, 1, %v1390_v63  ;;  %v676_v26 = vmul.f32 %v670_v59, %v1724_v55 }
  0xea   :  { %v794_v1 = vclz %v793_v52  ;;  %v911_v11 = vadd.s32 %v909_v5, %v907_v54  ;;  %v929_v18 = vadd.s32 %v927_v14, %v921_v7  ;;  %vm930_vm5 = vc.u32 %v928_v12, %v924_v8 }
  0xeb   :  { %v782_v19 = vadd.s32 %v1659_v28, %v1665_v33  ;;  %v931_v21 = vsel %vm930_vm5, 1, %v1390_v63  ;;  %v1739_v22 = vadd.f32 %v681_v4, %v676_v26  ;;  %v879_v53 = vsel %vm875_vm12, %v859_v13, %v1682_v47 }
  0xec   :  { %v1202_v10 = vadd.s32 4294967294, %v794_v1  ;;  %v912_v15 = vadd.s32 %v911_v11, %v901_v56  ;;  %v903_v25 = vshrl.u32 %v898_v17, 16  ;;  %v881_v57 = vsel %vm877_vm14, %v1684_v48, %v880_v24  ;;  %v1756_v48 = vld [vmem:[%s1911_s4] sm:$0x7]  ;;  %s1391_s4 = smov [#allocation11]  }
  0xed   :  { %v923_v27 = vshrl.u32 %v919_v35, 16  ;;  %v933_v38 = vadd.s32 %v931_v21, %v929_v18  ;;  %v1001_v28 = vand.u32 2139095040, %v1739_v22  ;;  %v812_v42 = vsub.s32 4, %v1719_v16  ;;  %s1187_s21 = sshll.u32 %s1391_s4, 4  ;;  %s1188_s21 = int_to_ptr.vmem [resolvable:$true] %s1187_s21 }
  0xee   :  { %vm1203_vm4 = vcmp.lt.s32.totalorder %v1202_v10, 0  ;;  %v1748_v41 = vadd.s32 %v912_v15, %v903_v25  ;;  %v925_v43 = vshrl.u32 %v920_v44, 16  ;;  %v1751_v50 = vadd.s32 %v928_v12, %v924_v8 }
  0xef   :  { %v797_v20 = vsel %vm1203_vm4, 0, %v1202_v10  ;;  %v934_v45 = vadd.s32 %v933_v38, %v923_v27  ;;  %v1002_v46 = vshrl.u32 %v1001_v28, 23  ;;  %v882_v35 = vsel %vm876_vm15, %v879_v53, %v881_v57 }
  0xf0   :  { %v798_v32 = vsub.s32 32, %v797_v20  ;;  %v802_v23 = vsub.s32 4294967266, %v797_v20  ;;  %v799_v33 = vshll.u32 %v790_v37, %v797_v20  ;;  %vm690_vm6 = vcmp.lt.s32.totalorder %v1590_v34, 0 }
  0xf1   :  { %v935_v37 = vadd.s32 %v934_v45, %v925_v43  ;;  %v1207_v51 = vadd.s32 4294967169, %v1002_v46  ;;  %vm938_vm7 = vc.u32 %v1748_v41, %v1751_v50  ;;  %v813_v44 = vsel %vm690_vm6, %v812_v42, %v1719_v16 }
  0xf2   :  { %v800_v39 = vshrl.u32 %v782_v19, %v798_v32  ;;  %v803_v40 = vadd.s32 127, %v802_v23  ;;  %v1155_v4 = vperm.slane %v1756_v48, 0  ;;  %v936_v30 = vmul.u32 %v1692_v61, %v882_v35 }
  0xf3   :  { %v939_v54 = vadd.s32 1, %v935_v37  ;;  %v1008_v59 = vadd.s32 1, %v1207_v51  ;;  %vm1770_vm8 = vcmp.le.f32.partialorder %v688_v36, 0.7853982  ;;  %v998_v7 = vand.u32 2147483647, %v1739_v22 }
  0xf4   :  { %v801_v47 = vor.u32 %v800_v39, %v799_v33  ;;  %v804_v17 = vshll.u32 %v803_v40, 23  ;;  %v815_v16 = vsel %vm1770_vm8, 0, %v813_v44  ;;  %v1778_v14 = vmul.f32 %v1155_v4, %v1586_v29 }
  0xf5   :  { %v940_v5 = vsel %vm938_vm7, %v939_v54, %v935_v37  ;;  %vm1009_vm9 = vcmp.gt.s32.totalorder %v1008_v59, 0  ;;  %v832_v61 = vadd.s32 3, %v815_v16  ;;  %v1005_v36 = vand.u32 8388607, %v998_v7 }
  0xf6   :  { %v805_v52 = vor.u32 4788187, %v804_v17  ;;  %v808_v2 = vcvt.s32.f32 %v801_v47  ;;  %v941_v10 = vadd.s32 %v940_v5, %v936_v30  ;;  %v1010_v11 = vsel %vm1009_vm9, %v1008_v59, 0 }
  0xf7   :  { %v1012_v12 = vand.u32 31, %v1010_v11  ;;  %v1786_v19 = vshrl.u32 %v1010_v11, 5  ;;  %v1006_v45 = vor.u32 8388608, %v1005_v36  ;;  %vm831_vm2 = vweird.f32 %v1590_v34 }
  0xf8   :  { %v806_v1 = vand.u32 2147483647, %v805_v52  ;;  %v942_v24 = vadd.s32 536870912, %v941_v10  ;;  %vm845_vm4 = vcmp.lt.s32.totalorder %v1607_v62, 0 }
  0xf9   :  { %v1013_v26 = vsub.s32 32, %v1012_v12  ;;  %v1015_v20 = vshll.u32 %v1384_v58, %v1012_v12  ;;  %v1018_v32 = vshll.u32 %v1385_v60, %v1012_v12  ;;  %v1021_v57 = vshll.u32 %v1386_v0, %v1012_v12 }
  0xfa   :  { %v809_v8 = vmul.f32 %v808_v2, %v806_v1  ;;  %v1784_v18 = vshrl.u32 %v942_v24, 30  ;;  %v1024_v47 = vshll.u32 %v1387_v3, %v1012_v12  ;;  %vm1030_vm11 = vcmp.lt.s32.totalorder %v1786_v19, 1 }
  0xfb   :  { %v1016_v29 = vshrl.u32 %v1385_v60, %v1013_v26  ;;  %v1019_v23 = vshrl.u32 %v1386_v0, %v1013_v26  ;;  %v1022_v27 = vshrl.u32 %v1387_v3, %v1013_v26  ;;  %v1025_v33 = vshrl.u32 %v1388_v6, %v1013_v26 }
  0xfc   :  { %v810_v13 = vxor.u32 2147483648, %v809_v8  ;;  %v944_v25 = vshll.u32 %v1784_v18, 30  ;;  %v1028_v39 = vshrl.u32 %v1389_v9, %v1013_v26  ;;  %v1804_v60 = vand.u32 3, %v832_v61 }
  0xfd   :  { %v1017_v38 = vor.u32 %v1016_v29, %v1015_v20  ;;  %v1020_v28 = vor.u32 %v1019_v23, %v1018_v32  ;;  %v1023_v46 = vor.u32 %v1022_v27, %v1021_v57  ;;  %v1027_v0 = vshll.u32 %v1388_v6, %v1012_v12  ;;  %v1851_v57 = vld [vmem:[#allocation10] sm:$0x7] }
  0xfe   :  { %v811_v15 = vsel %vm690_vm6, %v810_v13, %v809_v8  ;;  %v1806_v43 = vsub.s32 %v941_v10, %v944_v25  ;;  %v1014_v9 = vshrl.u32 %v1384_v58, %v1013_v26  ;;  %v1026_v51 = vor.u32 %v1025_v33, %v1024_v47 }
  0xff   :  { %v1792_v21 = vsel %vm1770_vm8, %v1590_v34, %v811_v15  ;;  %v1029_v52 = vor.u32 %v1028_v39, %v1027_v0  ;;  %vm1033_vm12 = vcmp.lt.s32.totalorder %v1786_v19, 4  ;;  %vm1032_vm13 = vcmp.lt.s32.totalorder %v1786_v19, 3 }
 0x100   :  { %v816_v53 = vmul.f32 %v1792_v21, %v1792_v21  ;;  %vm946_vm10 = vcmp.lt.s32.totalorder %v1806_v43, 0  ;;  %v947_v37 = vsub.s32 0, %v1806_v43  ;;  %v1034_v6 = vsel %vm1030_vm11, %v1014_v9, %v1017_v38 }
 0x101   :  { %v1035_v1 = vsel %vm1033_vm12, %v1023_v46, 2102212464  ;;  %v1038_v30 = vsel %vm1030_vm11, %v1017_v38, %v1020_v28  ;;  %vm835_vm14 = vcmp.eq.s32.totalorder %v1804_v60, 0  ;;  %vm838_vm15 = vcmp.eq.s32.totalorder %v1804_v60, 2 }
 0x102   :  { %v817_v40 = vmul.f32 -0.001358992, %v816_v53  ;;  %v824_v42 = vmul.f32 -0.00019511016, %v816_v53  ;;  %v948_v59 = vsel %vm946_vm10, %v947_v37, %v1806_v43  ;;  %v1036_v4 = vsel %vm1032_vm13, %v1020_v28, %v1035_v1 }
 0x103   :  { %v949_v3 = vclz %v948_v59  ;;  %vm1031_vm0 = vcmp.lt.s32.totalorder %v1786_v19, 2  ;;  %v1828_v5 = vshll.u32 %v1006_v45, 8  ;;  %vm834_vm1 = vcmp.lt.s32.totalorder %v1804_v60, 2 }
 0x104   :  { %v818_v17 = vadd.f32 0.041655596, %v817_v40  ;;  %v825_v35 = vadd.f32 0.008332121, %v824_v42  ;;  %v1833_v10 = vsel %vm1031_vm0, %v1034_v6, %v1036_v4  ;;  %v1039_v11 = vsel %vm1033_vm12, %v1026_v51, 920167782 }
 0x105   :  { %v1205_v56 = vadd.s32 4294967294, %v949_v3  ;;  %v1040_v12 = vsel %vm1032_vm13, %v1023_v46, %v1039_v11  ;;  %v1042_v13 = vsel %vm1030_vm11, %v1020_v28, %v1023_v46  ;;  %v1043_v24 = vsel %vm1033_vm12, %v1029_v52, 1326507024 }
 0x106   :  { %v819_v44 = vmul.f32 %v818_v17, %v816_v53  ;;  %v826_v54 = vmul.f32 %v825_v35, %v816_v53  ;;  %v1041_v15 = vsel %vm1031_vm0, %v1038_v30, %v1040_v12  ;;  %v937_v20 = vadd.s32 %v1751_v50, %v1748_v41 }
 0x107   :  { %vm1206_vm3 = vcmp.lt.s32.totalorder %v1205_v56, 0  ;;  %v1044_v23 = vsel %vm1032_vm13, %v1026_v51, %v1043_v24  ;;  %v1047_v50 = vand.u32 65535, %v1828_v5  ;;  %v1048_v42 = vshrl.u32 %v1828_v5, 16 }
 0x108   :  { %v820_v58 = vadd.f32 -0.4999988, %v819_v44  ;;  %v827_v2 = vadd.f32 -0.16666654, %v826_v54  ;;  %v952_v26 = vsel %vm1206_vm3, 0, %v1205_v56  ;;  %v1045_v38 = vsel %vm1031_vm0, %v1042_v13, %v1044_v23 }
 0x109   :  { %v953_v29 = vsub.s32 32, %v952_v26  ;;  %v957_v32 = vsub.s32 4294967266, %v952_v26  ;;  %v954_v27 = vshll.u32 %v1806_v43, %v952_v26  ;;  %v1049_v39 = vand.u32 65535, %v1045_v38 }
 0x10a   :  { %v821_v8 = vmul.f32 %v820_v58, %v816_v53  ;;  %v828_v16 = vmul.f32 %v827_v2, %v816_v53  ;;  %v1050_v40 = vshrl.u32 %v1045_v38, 16  ;;  %v1072_v45 = vshrl.u32 %v1041_v15, 16 }
 0x10b   :  { %v955_v28 = vshrl.u32 %v937_v20, %v953_v29  ;;  %v958_v33 = vadd.s32 127, %v957_v32  ;;  %v1071_v0 = vand.u32 65535, %v1041_v15  ;;  %v1053_v35 = vmul.u32 %v1049_v39, %v1048_v42 }
 0x10c   :  { %v822_v61 = vadd.f32 1.0, %v821_v8  ;;  %v829_v36 = vadd.f32 1.0, %v828_v16  ;;  %v1052_v17 = vmul.u32 %v1050_v40, %v1047_v50  ;;  %v1074_v51 = vmul.u32 %v1072_v45, %v1047_v50 }
 0x10d   :  { %v956_v46 = vor.u32 %v955_v28, %v954_v27  ;;  %v959_v47 = vshll.u32 %v958_v33, 23  ;;  %v1051_v44 = vmul.u32 %v1049_v39, %v1047_v50  ;;  %v1054_v54 = vmul.u32 %v1050_v40, %v1048_v42 }
 0x10e   :  { %v830_v53 = vmul.f32 %v829_v36, %v1792_v21  ;;  %v839_v25 = vxor.u32 2147483648, %v822_v61  ;;  %v1166_v21 = vperm.slane %v1851_v57, 0  ;;  %v1055_v59 = vshll.u32 %v1052_v17, 16 }
 0x10f   :  { %v960_v9 = vor.u32 4788187, %v959_v47  ;;  %v963_v1 = vcvt.s32.f32 %v956_v46  ;;  %v1075_v58 = vmul.u32 %v1071_v0, %v1048_v42  ;;  %v1057_v2 = vshll.u32 %v1053_v35, 16 }
 0x110   :  { %v836_v41 = vxor.u32 2147483648, %v830_v53  ;;  %v840_v19 = vsel %vm838_vm15, %v839_v25, %v830_v53  ;;  %vm1059_vm5 = vc.u32 %v1051_v44, %v1055_v59  ;;  %v1061_v4 = vadd.s32 %v1055_v59, %v1051_v44 }
 0x111   :  { %v961_v6 = vand.u32 2147483647, %v960_v9  ;;  %v1077_v30 = vshll.u32 %v1074_v51, 16  ;;  %v1060_v8 = vsel %vm1059_vm5, 1, %v1390_v63  ;;  %v1073_v16 = vmul.u32 %v1071_v0, %v1047_v50 }
 0x112   :  { %v837_v43 = vsel %vm835_vm14, %v822_v61, %v836_v41  ;;  %v1062_v11 = vadd.s32 %v1060_v8, %v1054_v54  ;;  %vm1063_vm6 = vc.u32 %v1061_v4, %v1057_v2  ;;  %v1076_v34 = vmul.u32 %v1072_v45, %v1048_v42 }
 0x113   :  { %v841_v37 = vsel %vm834_vm1, %v837_v43, %v840_v19  ;;  %v964_v56 = vmul.f32 %v963_v1, %v961_v6  ;;  %v1079_v12 = vshll.u32 %v1075_v58, 16  ;;  %v1064_v24 = vsel %vm1063_vm6, 1, %v1390_v63 }
 0x114   :  { %v842_v52 = vsel %vm831_vm2, nan, %v841_v37  ;;  %vm1081_vm7 = vc.u32 %v1073_v16, %v1077_v30  ;;  %v1083_v61 = vadd.s32 %v1077_v30, %v1073_v16  ;;  %vm1873_vm8 = vcmp.le.f32.partialorder %v843_v31, 0.7853982 }
 0x115   :  { %v1172_v3 = vmul.f32 %v1166_v21, %v842_v52  ;;  %v965_v13 = vxor.u32 2147483648, %v964_v56  ;;  %v1066_v26 = vadd.s32 %v1064_v24, %v1062_v11  ;;  %v1082_v15 = vsel %vm1081_vm7, 1, %v1390_v63 }
 0x116   :  { %v967_v29 = vsub.s32 4, %v1784_v18  ;;  %v1084_v32 = vadd.s32 %v1082_v15, %v1076_v34  ;;  %vm1085_vm9 = vc.u32 %v1083_v61, %v1079_v12  ;;  %v1058_v53 = vshrl.u32 %v1053_v35, 16 }
 0x117   :  { %v1175_v60 = vadd.f32 %v1172_v3, %v1778_v14  ;;  %v1056_v14 = vshrl.u32 %v1052_v17, 16  ;;  %v966_v20 = vsel %vm845_vm4, %v965_v13, %v964_v56  ;;  %v1086_v25 = vsel %vm1085_vm9, 1, %v1390_v63 }
 0x118   :  { %v969_v23 = vsel %vm1873_vm8, %v1607_v62, %v966_v20  ;;  %v1078_v38 = vshrl.u32 %v1074_v51, 16  ;;  %v1088_v28 = vadd.s32 %v1086_v25, %v1084_v32  ;;  %v1087_v39 = vadd.s32 %v1083_v61, %v1079_v12 }
 0x119   :  { %1178 = vst [vmem:[#allocation11] sm:$0xff] %v1175_v60  ;;  %v1067_v31 = vadd.s32 %v1066_v26, %v1056_v14  ;;  %v971_v27 = vmul.f32 %v969_v23, %v969_v23  ;;  %v1080_v50 = vshrl.u32 %v1075_v58, 16  ;;  %v968_v45 = vsel %vm845_vm4, %v967_v29, %v1784_v18 }
 0x11a   :  { %v1089_v42 = vadd.s32 %v1088_v28, %v1078_v38  ;;  %v970_v63 = vsel %vm1873_vm8, 0, %v968_v45  ;;  %v1091_v35 = vmul.u32 %v1828_v5, %v1833_v10  ;;  %v1156_v56 = vperm.slane %v1756_v48, 1 }
 0x11b   :  { %v1068_v33 = vadd.s32 %v1067_v31, %v1058_v53  ;;  %v972_v40 = vmul.f32 -0.001358992, %v971_v27  ;;  %v979_v41 = vmul.f32 -0.00019511016, %v971_v27  ;;  %v987_v52 = vadd.s32 3, %v970_v63 }
 0x11c   :  { %v1090_v0 = vadd.s32 %v1089_v42, %v1080_v50  ;;  %v1167_v5 = vperm.slane %v1851_v57, 1  ;;  %vm986_vm14 = vweird.f32 %v1607_v62  ;;  %v1162_v13 = vmul.f32 %v1156_v56, %v1597_v49 }
 0x11d   :  { %v1092_v21 = vadd.s32 %v1087_v39, %v1068_v33  ;;  %vm1093_vm10 = vc.u32 %v1068_v33, %v1087_v39  ;;  %v973_v46 = vadd.f32 0.041655596, %v972_v40  ;;  %v980_v47 = vadd.f32 0.008332121, %v979_v41 }
 0x11e   :  { %v1094_v17 = vadd.s32 1, %v1090_v0  ;;  %v988_v1 = vand.u32 3, %v987_v52  ;;  %vm1000_vm1 = vcmp.lt.s32.totalorder %v1739_v22, 0  ;;  %vm999_vm2 = vcmp.le.f32.partialorder %v998_v7, 0.7853982 }
 0x11f   :  { %v974_v43 = vmul.f32 %v973_v46, %v971_v27  ;;  %v981_v19 = vmul.f32 %v980_v47, %v971_v27  ;;  %vm1141_vm6 = vweird.f32 %v1739_v22  ;;  %vm1180_vm7 = vcmask 785408  }
 0x120   :  { %v1095_v51 = vsel %vm1093_vm10, %v1094_v17, %v1090_v0  ;;  %vm990_vm11 = vcmp.eq.s32.totalorder %v988_v1, 0  ;;  %vm993_vm12 = vcmp.eq.s32.totalorder %v988_v1, 2  ;;  %vm989_vm13 = vcmp.lt.s32.totalorder %v988_v1, 2 }
 0x121   :  { %v975_v37 = vadd.f32 -0.4999988, %v974_v43  ;;  %v982_v9 = vadd.f32 -0.16666654, %v981_v19  ;;  %v1096_v44 = vadd.s32 %v1095_v51, %v1091_v35 }
 0x123   :  { %v976_v18 = vmul.f32 %v975_v37, %v971_v27  ;;  %v983_v54 = vmul.f32 %v982_v9, %v971_v27  ;;  %v1097_v59 = vadd.s32 536870912, %v1096_v44 }
 0x125   :  { %v977_v3 = vadd.f32 1.0, %v976_v18  ;;  %v984_v6 = vadd.f32 1.0, %v983_v54  ;;  %v1098_v58 = vshrl.u32 %v1097_v59, 30  ;;  %v1157_v59 = vperm.slane %v1756_v48, 2 }
 0x127   :  { %v985_v2 = vmul.f32 %v984_v6, %v969_v23  ;;  %v994_v4 = vxor.u32 2147483648, %v977_v3  ;;  %v1099_v30 = vshll.u32 %v1098_v58, 30  ;;  %v1122_v33 = vsub.s32 4, %v1098_v58 }
 0x129   :  { %v991_v60 = vxor.u32 2147483648, %v985_v2  ;;  %v1100_v10 = vsub.s32 %v1096_v44, %v1099_v30  ;;  %v995_v16 = vsel %vm993_vm12, %v994_v4, %v985_v2  ;;  %v1123_v50 = vsel %vm1000_vm1, %v1122_v33, %v1098_v58 }
 0x12a   :  { %v1163_v2 = vmul.f32 %v1157_v59, %v1724_v55 }
 0x12b   :  { %v992_v8 = vsel %vm990_vm11, %v977_v3, %v991_v60  ;;  %vm1101_vm15 = vcmp.lt.s32.totalorder %v1100_v10, 0  ;;  %v1102_v34 = vsub.s32 0, %v1100_v10  ;;  %v1168_v3 = vperm.slane %v1851_v57, 2 }
 0x12c   :  { %v996_v11 = vsel %vm989_vm13, %v992_v8, %v995_v16 }
 0x12d   :  { %v997_v12 = vsel %vm986_vm14, nan, %v996_v11  ;;  %v1103_v61 = vsel %vm1101_vm15, %v1102_v34, %v1100_v10 }
 0x12e   :  { %v1173_v24 = vmul.f32 %v1167_v5, %v997_v12  ;;  %v1104_v36 = vclz %v1103_v61 }
 0x130   :  { %v1176_v14 = vadd.f32 %v1173_v24, %v1162_v13  ;;  %v1208_v26 = vadd.s32 4294967294, %v1104_v36 }
 0x132   :  { %1179 = vst [vmem:[#allocation11 + $0x8] sm:$0xff] %v1176_v14  ;;  %vm1209_vm0 = vcmp.lt.s32.totalorder %v1208_v26, 0 }
 0x133   :  { %v1107_v15 = vsel %vm1209_vm0, 0, %v1208_v26 }
 0x134   :  { %v1108_v20 = vsub.s32 32, %v1107_v15  ;;  %v1112_v29 = vsub.s32 4294967266, %v1107_v15  ;;  %v1109_v32 = vshll.u32 %v1100_v10, %v1107_v15 }
 0x136   :  { %v1110_v23 = vshrl.u32 %v1092_v21, %v1108_v20  ;;  %v1113_v53 = vadd.s32 127, %v1112_v29  ;;  %v1125_v21 = vsel %vm999_vm2, 0, %v1123_v50 }
 0x137   :  { %v1142_v43 = vadd.s32 3, %v1125_v21 }
 0x138   :  { %v1111_v62 = vor.u32 %v1110_v23, %v1109_v32  ;;  %v1114_v31 = vshll.u32 %v1113_v53, 23 }
 0x139   :  { %v1143_v9 = vand.u32 3, %v1142_v43 }
 0x13a   :  { %v1115_v25 = vor.u32 4788187, %v1114_v31  ;;  %v1118_v38 = vcvt.s32.f32 %v1111_v62 }
 0x13b   :  { %vm1148_vm3 = vcmp.eq.s32.totalorder %v1143_v9, 2  ;;  %vm1145_vm4 = vcmp.eq.s32.totalorder %v1143_v9, 0  ;;  %vm1144_vm5 = vcmp.lt.s32.totalorder %v1143_v9, 2 }
 0x13c   :  { %v1116_v27 = vand.u32 2147483647, %v1115_v25 }
 0x13e   :  { %v1119_v28 = vmul.f32 %v1118_v38, %v1116_v27 }
 0x140   :  { %v1120_v49 = vxor.u32 2147483648, %v1119_v28 }
 0x142   :  { %v1121_v39 = vsel %vm1000_vm1, %v1120_v49, %v1119_v28 }
 0x143   :  { %v1124_v40 = vsel %vm999_vm2, %v1739_v22, %v1121_v39 }
 0x144   :  { %v1126_v41 = vmul.f32 %v1124_v40, %v1124_v40 }
 0x146   :  { %v1127_v42 = vmul.f32 -0.001358992, %v1126_v41  ;;  %v1134_v45 = vmul.f32 -0.00019511016, %v1126_v41 }
 0x148   :  { %v1128_v46 = vadd.f32 0.041655596, %v1127_v42  ;;  %v1135_v47 = vadd.f32 0.008332121, %v1134_v45 }
 0x14a   :  { %v1129_v0 = vmul.f32 %v1128_v46, %v1126_v41  ;;  %v1136_v63 = vmul.f32 %v1135_v47, %v1126_v41 }
 0x14c   :  { %v1130_v19 = vadd.f32 -0.4999988, %v1129_v0  ;;  %v1137_v17 = vadd.f32 -0.16666654, %v1136_v63 }
 0x14e   :  { %v1131_v35 = vmul.f32 %v1130_v19, %v1126_v41  ;;  %v1138_v37 = vmul.f32 %v1137_v17, %v1126_v41 }
 0x150   :  { %v1132_v51 = vadd.f32 1.0, %v1131_v35  ;;  %v1139_v7 = vadd.f32 1.0, %v1138_v37 }
 0x152   :  { %v1140_v52 = vmul.f32 %v1139_v7, %v1124_v40  ;;  %v1149_v44 = vxor.u32 2147483648, %v1132_v51 }
 0x154   :  { %v1146_v18 = vxor.u32 2147483648, %v1140_v52  ;;  %v1150_v54 = vsel %vm1148_vm3, %v1149_v44, %v1140_v52 }
 0x156   :  { %v1147_v6 = vsel %vm1145_vm4, %v1132_v51, %v1146_v18 }
 0x157   :  { %v1151_v1 = vsel %vm1144_vm5, %v1147_v6, %v1150_v54 }
 0x158   :  { %v1152_v58 = vsel %vm1141_vm6, nan, %v1151_v1 }
 0x159   :  { %v1174_v4 = vmul.f32 %v1168_v3, %v1152_v58 }
 0x15b   :  { %v1177_v30 = vadd.f32 %v1174_v4, %v1163_v2 }
 0x15d   :  { %1181 = vst.msk [vmem:[#allocation11 + $0x10] sm:$0xff] %vm1180_vm7, %v1177_v30 }
 0x15e   :  { %1192 = dma.vmem_to_hbm [thread:$0]  %s1188_s21, 384, %s1190_s24, [#allocation4]  }
 0x15f   :  { %1375 = dma.done.wait [#allocation4], 384  }
 0x160   :  { %1376 = vsyncadd [#allocation4], 4294966912 }
 0x161   :  { %1197 = vsyncpa [#allocation3], 1 }
 0x162   :  { %1198 = vsyncpa [#allocation6], 1 }
 0x163   :  { %1199 = vsyncpa [#allocation9], 1 }
 0x164   :  { %1200 = vsyncpa [#allocation4], 1 }

</bundles_post_ra>
